<compile_context>
chip_gen: v5e
topology: v5e:2x2
jax: 0.10.0
libtpu: 0.0.40
codegen_flags: <defaults>
</compile_context>

<pallas_src>
import functools

import jax
import jax.numpy as jnp
from jax.experimental import pallas as pl
from jax.experimental.pallas import tpu as pltpu

LN_EPS = 1e-5
COMPUTE_DTYPE = jnp.bfloat16        # MXU feed dtype; accumulation stays f32


def _round_up(x, m):
    return (x + m - 1) // m * m


def _layernorm(x, gamma, beta):
    x = x.astype(jnp.float32)                       # stats in f32
    mean = jnp.mean(x, axis=-1, keepdims=True)
    var = jnp.mean((x - mean) ** 2, axis=-1, keepdims=True)
    return (x - mean) * jax.lax.rsqrt(var + LN_EPS) * gamma + beta


# ----------------------------- kernels --------------------------------------


def patch_embed_kernel(patches_ref, w_ref, bias_ref, out_ref):
    # patches_ref: (1, Npad, Pd) bf16   w_ref: (Pd, E) bf16   bias_ref: (Npad, E) f32
    # bias row 0 = cls + pos[0]; rows 1..Np = pos + conv bias; padded rows = 0.
    proj = jnp.dot(patches_ref[0], w_ref[...], preferred_element_type=jnp.float32)
    out_ref[0] = (proj + bias_ref[...]).astype(out_ref.dtype)


def transformer_block_kernel(x_ref, mask_ref,
                             wq_ref, bq_ref, wk_ref, bk_ref, wv_ref, bv_ref,
                             wo_ref, bo_ref, g1_ref, b1_ref,
                             w1_ref, bf1_ref, w2_ref, bf2_ref,
                             g2_ref, b2_ref, out_ref,
                             *, num_heads):
    x = x_ref[0]                                        # (Npad, E) bf16
    n_pad, emb = x.shape
    xf = x.astype(jnp.float32)

    # ---- multi-head attention: all heads batched through dot_general ------
    xh = jnp.broadcast_to(x, (num_heads, n_pad, emb))   # (H, N, E) bf16
    q = jnp.einsum("hne,hed->hnd", xh, wq_ref[...],
                   preferred_element_type=jnp.float32) + bq_ref[...]
    k = jnp.einsum("hne,hed->hnd", xh, wk_ref[...],
                   preferred_element_type=jnp.float32) + bk_ref[...]
    v = jnp.einsum("hne,hed->hnd", xh, wv_ref[...],
                   preferred_element_type=jnp.float32) + bv_ref[...]

    # 1/sqrt(head_dim) is folded into wq/bq at parameter-prep time.
    scores = jnp.einsum("hnd,hmd->hnm",
                        q.astype(COMPUTE_DTYPE), k.astype(COMPUTE_DTYPE),
                        preferred_element_type=jnp.float32)       # (H, N, N)

    # additive key-padding mask: 0 for valid tokens, -1e30 for padded tokens
    scores = scores + mask_ref[...][None, :, :]                   # (1,1,N) bcast

    # softmax (f32 stats, EUP reciprocal); attention dropout -> identity (eval)
    m = jnp.max(scores, axis=-1, keepdims=True)
    p = jnp.exp(scores - m)
    denom = jnp.sum(p, axis=-1, keepdims=True)
    attn = p * pl.reciprocal(denom, approx=True)

    ctx = jnp.einsum("hnm,hmd->hnd",
                     attn.astype(COMPUTE_DTYPE), v.astype(COMPUTE_DTYPE),
                     preferred_element_type=jnp.float32)          # (H, N, hd)

    # output projection: per-head matmul + sum over heads  (== concat(heads) @ Wo)
    per_head = jnp.einsum("hnd,hde->hne",
                          ctx.astype(COMPUTE_DTYPE), wo_ref[...],
                          preferred_element_type=jnp.float32)     # (H, N, E)
    attn_out = jnp.sum(per_head, axis=0) + bo_ref[...]            # (N, E)

    x1 = _layernorm(attn_out + xf, g1_ref[...], b1_ref[...])      # (N, E) f32

    # ---- feed forward -------------------------------------------------------
    h = jnp.dot(x1.astype(COMPUTE_DTYPE), w1_ref[...],
                preferred_element_type=jnp.float32) + bf1_ref[...]
    h = jax.nn.gelu(h, approximate=False)                         # exact erf GELU
    ff = jnp.dot(h.astype(COMPUTE_DTYPE), w2_ref[...],
                 preferred_element_type=jnp.float32) + bf2_ref[...]
    # ff dropout -> identity (eval)
    out = _layernorm(ff + x1, g2_ref[...], b2_ref[...])
    out_ref[0] = out.astype(out_ref.dtype)


def head_kernel(x_ref, g_ref, b_ref, wc_ref, bc_ref, out_ref):
    # x_ref: (1, 8, E)  -- only the first 8 token rows are DMA'd; row 0 is cls.
    x0 = x_ref[0][0:1, :].astype(jnp.float32)                     # (1, E)
    x0 = _layernorm(x0, g_ref[...], b_ref[...])
    out_ref[...] = jnp.dot(x0.astype(COMPUTE_DTYPE), wc_ref[...],
                           preferred_element_type=jnp.float32) + bc_ref[...]


# ----------------------------- wrappers -------------------------------------


def _full_spec(shape):
    ndim = len(shape)
    return pl.BlockSpec(shape, lambda b, _n=ndim: (0,) * _n)


def _cparams():
    # explicit VMEM cap keeps bigger configs from tripping the small scoped
    # defaults; tiny configs fit trivially well under this.
    return pltpu.CompilerParams(dimension_semantics=("parallel",),
                                vmem_limit_bytes=64 * 1024 * 1024)


def patch_embed(patches_pad, w, bias):
    B, Npad, Pd = patches_pad.shape
    E = w.shape[1]
    flops = 2 * B * Npad * Pd * E
    bytes_accessed = (patches_pad.size * 2 + w.size * 2 + bias.size * 4
                      + B * Npad * E * 2)
    return pl.pallas_call(
        patch_embed_kernel,
        out_shape=jax.ShapeDtypeStruct((B, Npad, E), COMPUTE_DTYPE),
        grid=(B,),
        in_specs=[
            pl.BlockSpec((1, Npad, Pd), lambda b: (b, 0, 0)),
            _full_spec(w.shape),
            _full_spec(bias.shape),
        ],
        out_specs=pl.BlockSpec((1, Npad, E), lambda b: (b, 0, 0)),
        compiler_params=_cparams(),
        cost_estimate=pl.CostEstimate(flops=int(flops), transcendentals=0,
                                      bytes_accessed=int(bytes_accessed)),
    )(patches_pad, w, bias)


def transformer_block(x, key_mask, bp, *, num_heads):
    B, Npad, E = x.shape
    H = num_heads
    F = bp["w1"].shape[1]
    weights = [bp["wq"], bp["bq"], bp["wk"], bp["bk"], bp["wv"], bp["bv"],
               bp["wo"], bp["bo"], bp["g1"], bp["beta1"],
               bp["w1"], bp["bff1"], bp["w2"], bp["bff2"],
               bp["g2"], bp["beta2"]]
    kern = functools.partial(transformer_block_kernel, num_heads=num_heads)
    flops = 2 * B * (3 * Npad * E * E           # qkv projections
                     + 2 * Npad * Npad * E      # scores + attn @ v
                     + Npad * E * E             # output projection
                     + 2 * Npad * E * F)        # feed forward
    transcend = B * (H * Npad * Npad + 2 * Npad * F)
    wbytes = sum(int(w.size) * w.dtype.itemsize for w in weights)
    bytes_accessed = 2 * B * Npad * E * 2 + wbytes + key_mask.size * 4
    return pl.pallas_call(
        kern,
        out_shape=jax.ShapeDtypeStruct((B, Npad, E), COMPUTE_DTYPE),
        grid=(B,),
        in_specs=[pl.BlockSpec((1, Npad, E), lambda b: (b, 0, 0)),
                  _full_spec(key_mask.shape)]
                 + [_full_spec(w.shape) for w in weights],
        out_specs=pl.BlockSpec((1, Npad, E), lambda b: (b, 0, 0)),
        compiler_params=_cparams(),
        cost_estimate=pl.CostEstimate(flops=int(flops),
                                      transcendentals=int(transcend),
                                      bytes_accessed=int(bytes_accessed)),
    )(x, key_mask, *weights)


def classifier_head(x, g, beta, wc, bc):
    B, Npad, E = x.shape
    Cpad = wc.shape[1]
    rows = min(8, Npad)                       # sublane-aligned cls-row DMA only
    flops = 2 * B * E * Cpad
    bytes_accessed = B * rows * E * 2 + wc.size * 2 + bc.size * 4 + B * Cpad * 4
    return pl.pallas_call(
        head_kernel,
        out_shape=jax.ShapeDtypeStruct((B, Cpad), jnp.float32),
        grid=(B,),
        in_specs=[
            pl.BlockSpec((1, rows, E), lambda b: (b, 0, 0)),
            _full_spec(g.shape),
            _full_spec(beta.shape),
            _full_spec(wc.shape),
            _full_spec(bc.shape),
        ],
        out_specs=pl.BlockSpec((1, Cpad), lambda b: (b, 0)),
        compiler_params=_cparams(),
        cost_estimate=pl.CostEstimate(flops=int(flops), transcendentals=0,
                                      bytes_accessed=int(bytes_accessed)),
    )(x, g, beta, wc, bc)


# ----------------------------- glue / params --------------------------------


def patchify(x_nchw, patch_size):
    B, C, Hh, W = x_nchw.shape
    P = patch_size
    x = x_nchw.reshape(B, C, Hh // P, P, W // P, P)
    x = x.transpose(0, 2, 4, 1, 3, 5)            # (B, H/P, W/P, C, P, P)
    return x.reshape(B, (Hh // P) * (W // P), C * P * P)


def build_patch_input(x_nchw, patch_size, n_pad):
    patches = patchify(x_nchw, patch_size)       # (B, Np, Pd)
    B, Np, Pd = patches.shape
    out = jnp.zeros((B, n_pad, Pd), COMPUTE_DTYPE)   # row 0 = cls slot, tail = pad
    return out.at[:, 1:1 + Np, :].set(patches.astype(COMPUTE_DTYPE))


def init_params(key, *, in_channels, patch_size, emb_size, img_size,
                num_classes, depth, forward_expansion=4):
    Pd = in_channels * patch_size * patch_size
    N = (img_size // patch_size) ** 2 + 1
    ks = jax.random.split(key, 6 + depth)
    params = {
        "proj_w": 0.02 * jax.random.normal(ks[0], (Pd, emb_size), jnp.float32),
        "proj_b": 0.02 * jax.random.normal(ks[1], (1, emb_size), jnp.float32),
        "cls": jax.random.normal(ks[2], (1, emb_size), jnp.float32),
        "pos": jax.random.normal(ks[3], (N, emb_size), jnp.float32),
        "head_w": 0.02 * jax.random.normal(ks[4], (emb_size, num_classes), jnp.float32),
        "head_b": jnp.zeros((1, num_classes), jnp.float32),
        "final_g": jnp.ones((1, emb_size), jnp.float32),
        "final_beta": jnp.zeros((1, emb_size), jnp.float32),
        "blocks": [],
    }
    Hdim = forward_expansion * emb_size
    for d in range(depth):
        bk = jax.random.split(ks[6 + d], 6)
        params["blocks"].append({
            "wqkv": 0.02 * jax.random.normal(bk[0], (emb_size, 3 * emb_size), jnp.float32),
            "bqkv": jnp.zeros((1, 3 * emb_size), jnp.float32),
            "wo": 0.02 * jax.random.normal(bk[1], (emb_size, emb_size), jnp.float32),
            "bo": jnp.zeros((1, emb_size), jnp.float32),
            "g1": jnp.ones((1, emb_size), jnp.float32),
            "beta1": jnp.zeros((1, emb_size), jnp.float32),
            "w1": 0.02 * jax.random.normal(bk[2], (emb_size, Hdim), jnp.float32),
            "bff1": 0.02 * jax.random.normal(bk[3], (1, Hdim), jnp.float32),
            "w2": 0.02 * jax.random.normal(bk[4], (Hdim, emb_size), jnp.float32),
            "bff2": 0.02 * jax.random.normal(bk[5], (1, emb_size), jnp.float32),
            "g2": jnp.ones((1, emb_size), jnp.float32),
            "beta2": jnp.zeros((1, emb_size), jnp.float32),
        })
    return params


def prepare_kernel_params(params, *, num_heads, n_pad, c_pad):
    """Convert PyTorch-layout params into kernel-ready bf16, head-split slabs."""
    E = params["proj_w"].shape[1]
    hd = E // num_heads
    N = params["pos"].shape[0]
    scale = 1.0 / (hd ** 0.5)
    dt = COMPUTE_DTYPE

    # patch-embed per-token bias (cls / pos / conv bias folded together)
    bias = jnp.zeros((n_pad, E), jnp.float32)
    bias = bias.at[0].set(params["cls"][0] + params["pos"][0])
    bias = bias.at[1:N].set(params["pos"][1:] + params["proj_b"][0])

    # additive key-padding mask for attention scores (0 valid, -1e30 padded)
    key_mask = jnp.where(jnp.arange(n_pad) < N, 0.0, -1e30).astype(jnp.float32)
    key_mask = key_mask.reshape(1, n_pad)

    # classifier padded to a lane-dense width
    C = params["head_w"].shape[1]
    wc = jnp.zeros((E, c_pad), jnp.float32).at[:, :C].set(params["head_w"])
    bc = jnp.zeros((1, c_pad), jnp.float32).at[:, :C].set(params["head_b"])

    kp = {
        "pe_w": params["proj_w"].astype(dt),
        "pe_bias": bias,
        "key_mask": key_mask,
        "head_g": params["final_g"],
        "head_beta": params["final_beta"],
        "head_w": wc.astype(dt),
        "head_b": bc,
        "blocks": [],
    }

    def split(w, b):
        w = w.reshape(E, num_heads, hd).transpose(1, 0, 2)   # (H, E, hd)
        b = b.reshape(num_heads, 1, hd)                      # (H, 1, hd)
        return w, b

    for p in params["blocks"]:
        wqkv, bqkv = p["wqkv"], p["bqkv"][0]
        wq, bq = split(wqkv[:, :E], bqkv[:E])
        wk, bk = split(wqkv[:, E:2 * E], bqkv[E:2 * E])
        wv, bv = split(wqkv[:, 2 * E:], bqkv[2 * E:])
        kp["blocks"].append({
            "wq": (wq * scale).astype(dt), "bq": bq * scale,   # scale folded into q
            "wk": wk.astype(dt), "bk": bk,
            "wv": wv.astype(dt), "bv": bv,
            "wo": p["wo"].reshape(num_heads, hd, E).astype(dt),
            "bo": p["bo"],
            "g1": p["g1"], "beta1": p["beta1"],
            "w1": p["w1"].astype(dt), "bff1": p["bff1"],
            "w2": p["w2"].astype(dt), "bff2": p["bff2"],
            "g2": p["g2"], "beta2": p["beta2"],
        })
    return kp


def vit_forward(x_nchw, params, *, patch_size, num_heads):
    N = params["pos"].shape[0]
    C = params["head_w"].shape[1]
    n_pad = _round_up(N, 8)
    c_pad = _round_up(C, 128)
    kp = prepare_kernel_params(params, num_heads=num_heads,
                               n_pad=n_pad, c_pad=c_pad)
    patches = build_patch_input(x_nchw, patch_size, n_pad)
    x = patch_embed(patches, kp["pe_w"], kp["pe_bias"])
    for bp in kp["blocks"]:
        x = transformer_block(x, kp["key_mask"], bp, num_heads=num_heads)
    logits = classifier_head(x, kp["head_g"], kp["head_beta"],
                             kp["head_w"], kp["head_b"])
    return logits[:, :C]


# pure-JAX f32 reference (same math as the PyTorch module) for a sanity check
def vit_reference(x_nchw, params, *, patch_size, num_heads):
    patches = patchify(x_nchw, patch_size)
    proj = patches @ params["proj_w"] + params["proj_b"]
    B = proj.shape[0]
    cls = jnp.broadcast_to(params["cls"][None], (B, 1, params["cls"].shape[-1]))
    x = jnp.concatenate([cls, proj], axis=1) + params["pos"][None]
    E = params["proj_w"].shape[1]
    hd = E // num_heads
    for p in params["blocks"]:
        qkv = x @ p["wqkv"] + p["bqkv"]
        Bsz, N, _ = qkv.shape
        qkv = qkv.reshape(Bsz, N, 3, num_heads, hd).transpose(2, 0, 3, 1, 4)
        q, k, v = qkv[0], qkv[1], qkv[2]
        scores = jnp.einsum("bhnd,bhmd->bhnm", q, k) / (hd ** 0.5)
        attn = jax.nn.softmax(scores, axis=-1)
        out = jnp.einsum("bhnm,bhmd->bhnd", attn, v).transpose(0, 2, 1, 3).reshape(Bsz, N, E)
        out = out @ p["wo"] + p["bo"]
        x = _layernorm(out + x, p["g1"], p["beta1"])
        h1 = jax.nn.gelu(x @ p["w1"] + p["bff1"], approximate=False)
        ff = h1 @ p["w2"] + p["bff2"]
        x = _layernorm(ff + x, p["g2"], p["beta2"])
    x = _layernorm(x, params["final_g"], params["final_beta"])
    return x[:, 0] @ params["head_w"] + params["head_b"]


if __name__ == "__main__":
    # small config: ViT(in_channels=4, patch_size=4, emb_size=32, img_size=16,
    #                  num_classes=10, depth=2, num_heads=4)
    in_channels, patch_size, emb_size, img_size = 4, 4, 32, 16
    num_classes, depth, num_heads = 10, 2, 4
    B = 2

    key = jax.random.PRNGKey(0)
    k_x, k_p = jax.random.split(key)
    x = jax.random.normal(k_x, (B, in_channels, img_size, img_size), jnp.float32)
    params = init_params(k_p, in_channels=in_channels, patch_size=patch_size,
                         emb_size=emb_size, img_size=img_size,
                         num_classes=num_classes, depth=depth)

    out = vit_forward(x, params, patch_size=patch_size, num_heads=num_heads)
    out = jax.block_until_ready(out)

    ref = vit_reference(x, params, patch_size=patch_size, num_heads=num_heads)
    assert out.shape == (B, num_classes)
    # bf16 MXU feeds vs f32 reference -> allow small numerical drift
    assert jnp.allclose(out, ref, rtol=2e-2, atol=2e-2), (
        "mismatch vs JAX reference, max abs diff = "
        f"{float(jnp.max(jnp.abs(out - ref)))}")

    print("KERNEL_OK")
</pallas_src>

<mosaic_0001>
module attributes {stable_mosaic.version = 11 : i64} {
  func.func @patch_embed_kernel(%arg0: i32, %arg1: memref<1x24x64xbf16, #tpu.memory_space<vmem>>, %arg2: memref<64x32xbf16, #tpu.memory_space<vmem>>, %arg3: memref<24x32xf32, #tpu.memory_space<vmem>>, %arg4: memref<1x24x32xbf16, #tpu.memory_space<vmem>>) attributes {dimension_semantics = [#tpu.dimension_semantics<parallel>], iteration_bounds = array<i64: 2>, scalar_prefetch = 0 : i64, scratch_operands = 0 : i64, tpu.core_type = #tpu.core_type<tc>, window_params = [{transform_indices = @transform_0, window_bounds = array<i64: 1, 24, 64>}, {pipeline_mode = #tpu.pipeline_mode<synchronous>, transform_indices = @transform_1, window_bounds = array<i64: 64, 32>}, {pipeline_mode = #tpu.pipeline_mode<synchronous>, transform_indices = @transform_2, window_bounds = array<i64: 24, 32>}, {transform_indices = @transform_3, window_bounds = array<i64: 1, 24, 32>}]} {
    %c0 = arith.constant 0 : index
    %c0_0 = arith.constant 0 : index
    %c0_1 = arith.constant 0 : index
    %0 = vector.load %arg1[%c0, %c0_0, %c0_1] : memref<1x24x64xbf16, #tpu.memory_space<vmem>>, vector<1x24x64xbf16>
    %1 = vector.shape_cast %0 : vector<1x24x64xbf16> to vector<24x64xbf16>
    %c0_2 = arith.constant 0 : index
    %c0_3 = arith.constant 0 : index
    %2 = vector.load %arg2[%c0_2, %c0_3] : memref<64x32xbf16, #tpu.memory_space<vmem>>, vector<64x32xbf16>
    %cst = arith.constant dense<0.000000e+00> : vector<24x32xf32>
    %3 = tpu.matmul %1, %2, %cst {dimension_numbers = #tpu.dot_dimension_numbers<[1], [0], [0], [1], [0, 0, 1, 1], [], []>} : vector<24x64xbf16>, vector<64x32xbf16>, vector<24x32xf32> -> vector<24x32xf32>
    %c0_4 = arith.constant 0 : index
    %c0_5 = arith.constant 0 : index
    %4 = vector.load %arg3[%c0_4, %c0_5] : memref<24x32xf32, #tpu.memory_space<vmem>>, vector<24x32xf32>
    %5 = arith.addf %3, %4 : vector<24x32xf32>
    %6 = arith.truncf %5 : vector<24x32xf32> to vector<24x32xbf16>
    %c0_6 = arith.constant 0 : index
    %c0_7 = arith.constant 0 : index
    %c0_8 = arith.constant 0 : index
    %7 = vector.load %arg4[%c0_6, %c0_7, %c0_8] : memref<1x24x32xbf16, #tpu.memory_space<vmem>>, vector<1x24x32xbf16>
    %8 = vector.shape_cast %7 : vector<1x24x32xbf16> to vector<24x32xbf16>
    %9 = vector.shape_cast %6 : vector<24x32xbf16> to vector<1x24x32xbf16>
    tpu.vector_store %arg4[%c0_6, %c0_7, %c0_8], %9 {strides = array<i32>} : memref<1x24x32xbf16, #tpu.memory_space<vmem>>, vector<1x24x32xbf16>,
    return
  }
  func.func @transform_0(%arg0: i32) -> (i32, i32, i32) {
    %c0_i32 = arith.constant 0 : i32
    %c0_i32_0 = arith.constant 0 : i32
    %c0_i32_1 = arith.constant 0 : i32
    return %arg0, %c0_i32, %c0_i32_0 : i32, i32, i32
  }
  func.func @transform_1(%arg0: i32) -> (i32, i32) {
    %c0_i32 = arith.constant 0 : i32
    %c0_i32_0 = arith.constant 0 : i32
    %c0_i32_1 = arith.constant 0 : i32
    return %c0_i32, %c0_i32_0 : i32, i32
  }
  func.func @transform_2(%arg0: i32) -> (i32, i32) {
    %c0_i32 = arith.constant 0 : i32
    %c0_i32_0 = arith.constant 0 : i32
    %c0_i32_1 = arith.constant 0 : i32
    return %c0_i32, %c0_i32_0 : i32, i32
  }
  func.func @transform_3(%arg0: i32) -> (i32, i32, i32) {
    %c0_i32 = arith.constant 0 : i32
    %c0_i32_0 = arith.constant 0 : i32
    %c0_i32_1 = arith.constant 0 : i32
    return %arg0, %c0_i32, %c0_i32_0 : i32, i32, i32
  }
}

</mosaic_0001>

<bundles_post_ra>
// kernel: tpu_custom_call.1
= control target key start
LH: loop header
LB: loop body
LE: loop exit
PB: predicated region body
PF: predicated region fallthrough
CT: control target
= control target key end

     0   :  { %8 = vsyncpa [#allocation3], 0  ;;  %s604_s0 = inlined_call_operand.vmem [shape: bf16[2,24,64], index: 0, kind: input, shape index: {}]   ;;  %s605_s1 = inlined_call_operand.vmem [shape: bf16[64,32], index: 1, kind: input, shape index: {}]   ;;  %s606_s2 = inlined_call_operand.vmem [shape: f32[24,32], index: 2, kind: input, shape index: {}]   ;;  %s607_s3 = inlined_call_operand.hbm [shape: bf16[2,24,32], index: 3, kind: output, shape index: {}]  }
   0x1   :  { %10 = vsyncpa [#allocation3 + $0x1], 0  ;;  %s495_s12 = smov 0   ;;  %s497_s13 = smov 0  }
   0x2   :  { %s499_s14 = smov 0   ;;  %s501_s15 = smov 0  }
   0x3 LB: > { %s516_s16 = sadd.s32 4294967295, %s471_s15   ;;  %s326_s17 = sadd.s32 4294967294, %s471_s15   ;;  %s471_s15 = sphi %s501_s15, %s613_s15   ;;  %s467_s14 = sphi %s499_s14, %s612_s14   ;;  %s463_s13 = sphi %s497_s13, %s611_s13   ;;  %s459_s12 = sphi %s495_s12, %s610_s12  }
   0x4   : > { %s520_s18 = sadd.s32 1, %s471_s15   ;;  %s91_s19 = sadd.s32 1, %s467_s14 }
   0x5   : > { %s88_s20 = ssub.s32 %s471_s15, %s520_s18  ;;  %p101_p0 = scmp.ne.s32.totalorder %s467_s14, %s463_s13 }
   0x6   : > { %p89_p1 = scmp.eq.s32.totalorder %s88_s20, 0  ;;  %p102_p2 = scmp.eq.s32.totalorder %s516_s16, 1 }
   0x7   : > { %p107_p3 = scmp.ne.s32.totalorder %s463_s13, %s459_s12  ;;  %p108_p4 = scmp.eq.s32.totalorder %s326_s17, 1 }
   0x8   : > { %s531_s21 = scalar_select %p89_p1, %s467_s14, %s91_s19  }
   0x9   : > { %p533_p5 = por %p102_p2, %p101_p0  ;;  %p537_p6 = por %p108_p4, %p107_p3 }
   0xa   : > { %p329_p7 = scmp.ge.s32.totalorder %s471_s15, 1  ;;  %p140_p8 = scmp.lt.s32.totalorder %s471_s15, 3 }
   0xc   : > { %p141_p9 = pnand %p329_p7, %p140_p8 }
   0xd   : > { %p164_p10 = scmp.lt.s32.totalorder (!%p141_p9), %s516_s16, 1  ;;  %s161_s10 = sand.u32 (!%p141_p9), 1, %s463_s13  }
   0xe   : > { %144 = sbr.rel (%p141_p9) target bundleno = 177 (0xb1), region = 32  ;;  %s249_s6 = scalar_lea.sflag (!%p141_p9), [#allocation3], %s161_s10 }
   0xf   : > { %s365_s11 = smul.u32 (!%p141_p9), 12, %s161_s10  ;;  %s429_s17 = scalar_lea.hbm (!%p141_p9), %s607_s3, 24 }
  0x10   : > { %s367_s25 = smul.u32 (!%p141_p9), 12, %s516_s16 }
  0x13   : > { %v360_v0 = vld [vmem:[%s605_s1 + $0x18] sm:$0xff]  ;;  %v359_v1 = vld [vmem:[%s605_s1 + $0x10] sm:$0xff]  ;;  %s165_s28 = scalar_select %p164_p10, %s516_s16, 1  ;;  %v358_v2 = vld [vmem:[%s605_s1 + $0x8] sm:$0xff]  ;;  %vm216_vm0 = vcmask 523264   ;;  %vm244_vm1 = vcmask 257024  }
  0x14   : > { %227 = vmatpush.bf16.msra.mxu0 %v360_v0  ;;  %361 = vmatpush.bf16.msra.mxu1 %v360_v0  ;;  %v357_v5 = vld [vmem:[%s605_s1] sm:$0xff]  ;;  %v183_v9 = vld [vmem:[%s606_s2 + $0x10] sm:$0xff]  ;;  %v182_v16 = vld [vmem:[%s606_s2 + $0x8] sm:$0xff] }
  0x15   : > { %s366_s29 = smul.u32 12, %s165_s28  ;;  %v181_v8 = vld [vmem:[%s606_s2] sm:$0xff]  ;;  %s260_s28 = scalar_lea.hbm %s607_s3, %s367_s25 }
  0x16   : > { %s263_s5 = sshll.u32 %s260_s28, 4  ;;  %s264_s5 = int_to_ptr.hbm [resolvable:$true] %s263_s5 }
  0x17   : > { %s168_s7 = scalar_lea.vmem %s604_s0, %s366_s29  ;;  %s163_s29 = scalar_lea.vmem [#allocation2], %s365_s11 }
  0x18   : > { %228 = vmatpush.bf16.msra.mxu0 %v359_v1  ;;  %362 = vmatpush.bf16.msra.mxu1 %v359_v1  ;;  %v172_v3 = vld [vmem:[%s168_s7 + $0x8] sm:$0xf]  ;;  %v356_v6 = vld [vmem:[%s168_s7] sm:$0xff]  ;;  %s261_s16 = sshll.u32 %s163_s29, 4  ;;  %s423_s7 = sshra.s32 %s264_s5, 4  ;;  %s262_s16 = int_to_ptr.vmem [resolvable:$true] %s261_s16  ;;  %s424_s7 = int_to_ptr.hbm [resolvable:$true] %s423_s7 }
  0x19   : > { %v189_v4 = vunpack.c.l.b16 %v172_v3  ;;  %s425_s8 = scalar_lea.hbm %s424_s7, 12  ;;  %p430_p0 = scmp.lt.s32.totalorder %s424_s7, %s607_s3 }
  0x1a   : > { %p426_p11 = scmp.ne.s32.totalorder %s424_s7, %s425_s8  ;;  %p431_p1 = scmp.lt.s32.totalorder %s429_s17, %s425_s8 }
  0x1b   : > { %v191_v7 = vpack.c.b16 %v189_v4, %v189_v4 }
  0x1c   : > { %229 = vmatpush.bf16.msra.mxu0 %v358_v2  ;;  %363 = vmatpush.bf16.msra.mxu1 %v358_v2  ;;  %p427_p12 = pnand %p426_p11, %p533_p5  ;;  %p432_p2 = por %p431_p1, %p430_p0 }
  0x1e   : > { %p428_p13 = pneg %p427_p12 }
  0x20   : > { %230 = vmatpush.bf16.msra.mxu0 %v357_v5  ;;  %364 = vmatpush.bf16.msra.mxu1 %v357_v5  ;;  %p433_p3 = pnand %p432_p2, %p428_p13 }
  0x23   : > { %351 = vmatmul.msk.bf16.vlgmr.msra.gmra.mxu0 %vm216_vm0, %v356_v6  ;;  %352 = vmatmul.msk.bf16.vlgmr.msra.gmra.mxu1 %vm216_vm0, %v191_v7 }
  0xa0   : > { %v232_v10 = vpop.f32.mrf.mxu0  ;;  %v237_v11 = vpop.f32.mrf.mxu1 }
  0xa1   : > { %v233_v12 = vadd.f32 %v232_v10, %v181_v8  ;;  %v238_v13 = vadd.f32 %v237_v11, %v183_v9 }
  0xa3   : > { %v241_v14 = vpack.c.bf16 %v233_v12, %v233_v12  ;;  %v243_v15 = vpack.c.bf16 %v238_v13, %v238_v13 }
  0xa5   : > { %245 = vst.msk [vmem:[%s163_s29] sm:$0xf] %vm244_vm1, %v241_v14 }
  0xa6   : > { %247 = vst.msk [vmem:[%s163_s29 + $0x8] sm:$0xf] %vm244_vm1, %v243_v15 }
  0xa8   : > { %v234_v17 = vpop.f32.mrf.mxu0  ;;  %v239_v18 = vpop.f32.mrf.mxu1 }
  0xa9   : > { %v235_v19 = vadd.f32 %v234_v17, %v182_v16 }
  0xab   : > { %v242_v20 = vpack.c.bf16 %v235_v19, %v235_v19 }
  0xad   : > { %246 = vst.msk [vmem:[%s163_s29 + $0x4] sm:$0xf] %vm244_vm1, %v242_v20 }
  0xae   : > { %436 = shalt.err (!%p433_p3)
}
  0xaf   : > { %s473_s10 = smov 64   ;;  %s474_s24 = smov 4  }
  0xb0   : > { %368 = dma.vmem_to_hbm [thread:$0]  (%p533_p5), %s262_s16, 192, %s264_s5, %s249_s6, %s473_s10, %s473_s10, %s474_s24  }
  0xb1 PF: > { %p374_p4 = scmp.ge.s32.totalorder %s471_s15, 2  ;;  %s278_s25 = sand.u32 1, %s459_s12  }
  0xb2   : > { %s279_s26 = scalar_lea.sflag [#allocation3], %s278_s25 }
  0xb3   : > { %p371_p7 = pnand %p374_p4, %p537_p6 }
  0xb5   : > { %p372_p8 = pneg %p371_p7 }
  0xb7   : > { %454 = dma.done.wait (%p372_p8), %s279_s26, 192  }
  0xb8   : > { %456 = vsyncadd (%p372_p8), %s279_s26, 4294967104  ;;  %p13_p9 = scmp.ge.s32.totalorder %s520_s18, 4   ;;  %s610_s12 = smov %s463_s13 }
  0xb9   : > { %s611_s13 = smov %s467_s14  ;;  %s612_s14 = smov %s531_s21 }
  0xba   : > { %s613_s15 = smov %s520_s18  ;;  %15 = sbr.rel (!%p13_p9) target bundleno = 3 (0x3), region = 67 }
  0xbf   :  { %285 = vsyncpa [#allocation3], 1 }
  0xc0   :  { %287 = vsyncpa [#allocation3 + $0x1], 1 }

</bundles_post_ra>
